<compile_context>
chip_gen: v5e
topology: v5e:2x2
jax: 0.10.0
libtpu: 0.0.40
codegen_flags: <defaults>
</compile_context>

<pallas_src>
import functools

import jax
import jax.numpy as jnp
from jax.experimental import pallas as pl
from jax.experimental.pallas import tpu as pltpu


def _l_color_kernel(x_ref, o_ref, acc_ref, *, inv_hw):
    h = pl.program_id(1)

    @pl.when(h == 0)
    def _():
        acc_ref[...] = jnp.zeros_like(acc_ref)

    # x_ref block: (1, C, tH, W) -> elementwise f32 accumulate (no per-step reduction).
    acc_ref[...] += x_ref[0].astype(jnp.float32)

    @pl.when(h == pl.num_programs(1) - 1)
    def _():
        # Per-channel spatial means, kept as (1, 1) tiles (single cross-lane reduce here).
        mr = jnp.sum(acc_ref[0], axis=(0, 1), keepdims=True) * inv_hw
        mg = jnp.sum(acc_ref[1], axis=(0, 1), keepdims=True) * inv_hw
        mb = jnp.sum(acc_ref[2], axis=(0, 1), keepdims=True) * inv_hw
        drg = (mr - mg) * (mr - mg)
        drb = (mr - mb) * (mr - mb)
        dgb = (mb - mg) * (mb - mg)
        k = jnp.sqrt(drg * drg + drb * drb + dgb * dgb)      # (1, 1) per-image result
        o_ref[...] = k.reshape(1, 1, 1)


def _pick_tile_h(H, W, C, itemsize, budget_bytes=6 * 1024 * 1024):
    # Per-step VMEM footprint: 2 double-buffered input tiles + the f32 accumulator.
    def cost(th):
        return C * th * W * (2 * itemsize + 4)

    if cost(H) <= budget_bytes:
        return H
    cands = [th for th in range(8, H, 8) if H % th == 0 and cost(th) <= budget_bytes]
    if cands:
        return max(cands)
    return H  # fall back to full height (tiny/awkward shapes)


def l_color(x, *, tile_h=None):
    """mean_b sqrt(((mr-mg)^2)^2 + ((mr-mb)^2)^2 + ((mb-mg)^2)^2)  -> scalar f32."""
    B, C, H, W = x.shape
    assert C == 3, "L_color expects RGB input (C == 3)"
    tH = _pick_tile_h(H, W, C, x.dtype.itemsize) if tile_h is None else tile_h
    assert H % tH == 0
    nH = H // tH

    kernel = functools.partial(_l_color_kernel, inv_hw=1.0 / float(H * W))

    per_image = pl.pallas_call(
        kernel,
        out_shape=jax.ShapeDtypeStruct((B, 1, 1), jnp.float32),
        grid_spec=pltpu.PrefetchScalarGridSpec(
            num_scalar_prefetch=0,
            grid=(B, nH),
            in_specs=[
                pl.BlockSpec((1, C, tH, W), lambda b, h: (b, 0, h, 0)),
            ],
            out_specs=pl.BlockSpec((1, 1, 1), lambda b, h: (b, 0, 0)),
            scratch_shapes=[pltpu.VMEM((C, tH, W), jnp.float32)],
        ),
        compiler_params=pltpu.CompilerParams(
            dimension_semantics=("parallel", "arbitrary")),
    )(x)

    # Final (tiny) mean over the batch in plain JAX, as recommended: keeps the
    # batch axis parallel instead of a serially-carried scalar accumulator.
    return jnp.mean(per_image)


def _l_color_reference(x):
    xf = x.astype(jnp.float32)
    mean_rgb = jnp.mean(xf, axis=(2, 3), keepdims=True)         # (B, 3, 1, 1)
    mr, mg, mb = mean_rgb[:, 0], mean_rgb[:, 1], mean_rgb[:, 2]
    drg = (mr - mg) ** 2
    drb = (mr - mb) ** 2
    dgb = (mb - mg) ** 2
    k = jnp.sqrt(drg ** 2 + drb ** 2 + dgb ** 2)
    return jnp.mean(k)


if __name__ == "__main__":
    key = jax.random.PRNGKey(0)
    x = jax.random.uniform(key, (2, 3, 16, 16), dtype=jnp.float32)

    ref = _l_color_reference(x)

    # Default path: whole image in one H tile per grid step.
    d = jax.block_until_ready(l_color(x))
    assert jnp.allclose(d, ref, atol=1e-6, rtol=1e-5), (d, ref)

    # Tiled path: exercises the H-tile accumulation (init / accumulate / finalize).
    d_tiled = jax.block_until_ready(l_color(x, tile_h=8))
    assert jnp.allclose(d_tiled, ref, atol=1e-6, rtol=1e-5), (d_tiled, ref)

    print("KERNEL_OK")
</pallas_src>

<mosaic_0001>
module attributes {stable_mosaic.version = 11 : i64} {
  func.func @_l_color_kernel(%arg0: i32, %arg1: i32, %arg2: memref<1x3x16x16xf32, #tpu.memory_space<vmem>>, %arg3: memref<1x1x1xf32, #tpu.memory_space<vmem>>, %arg4: memref<3x16x16xf32, #tpu.memory_space<vmem>>) attributes {dimension_semantics = [#tpu.dimension_semantics<parallel>, #tpu.dimension_semantics<arbitrary>], iteration_bounds = array<i64: 2, 1>, scalar_prefetch = 0 : i64, scratch_operands = 1 : i64, tpu.core_type = #tpu.core_type<tc>, window_params = [{transform_indices = @transform_0, window_bounds = array<i64: 1, 3, 16, 16>}, {transform_indices = @transform_1, window_bounds = array<i64: 1, 1, 1>}]} {
    %c0_i32 = arith.constant 0 : i32
    %0 = arith.cmpi eq, %arg1, %c0_i32 : i32
    %1 = arith.extui %0 : i1 to i32
    %c0_i32_0 = arith.constant 0 : i32
    %2 = arith.cmpi ne, %1, %c0_i32_0 : i32
    scf.if %2 {
      %cst = arith.constant 0.000000e+00 : f32
      %11 = vector.broadcast %cst : f32 to vector<3x16x16xf32>
      %c0_12 = arith.constant 0 : index
      %c0_13 = arith.constant 0 : index
      %c0_14 = arith.constant 0 : index
      %12 = vector.load %arg4[%c0_12, %c0_13, %c0_14] : memref<3x16x16xf32, #tpu.memory_space<vmem>>, vector<3x16x16xf32>
      tpu.vector_store %arg4[%c0_12, %c0_13, %c0_14], %11 {strides = array<i32>} : memref<3x16x16xf32, #tpu.memory_space<vmem>>, vector<3x16x16xf32>,
    } else {
    }
    %c0 = arith.constant 0 : index
    %c0_1 = arith.constant 0 : index
    %c0_2 = arith.constant 0 : index
    %3 = vector.load %arg4[%c0, %c0_1, %c0_2] : memref<3x16x16xf32, #tpu.memory_space<vmem>>, vector<3x16x16xf32>
    %c0_3 = arith.constant 0 : index
    %c0_4 = arith.constant 0 : index
    %c0_5 = arith.constant 0 : index
    %c0_6 = arith.constant 0 : index
    %4 = vector.load %arg2[%c0_3, %c0_4, %c0_5, %c0_6] : memref<1x3x16x16xf32, #tpu.memory_space<vmem>>, vector<1x3x16x16xf32>
    %5 = vector.shape_cast %4 : vector<1x3x16x16xf32> to vector<3x16x16xf32>
    %6 = arith.addf %3, %5 : vector<3x16x16xf32>
    %c0_7 = arith.constant 0 : index
    %c0_8 = arith.constant 0 : index
    %c0_9 = arith.constant 0 : index
    %7 = vector.load %arg4[%c0_7, %c0_8, %c0_9] : memref<3x16x16xf32, #tpu.memory_space<vmem>>, vector<3x16x16xf32>
    tpu.vector_store %arg4[%c0_7, %c0_8, %c0_9], %6 {strides = array<i32>} : memref<3x16x16xf32, #tpu.memory_space<vmem>>, vector<3x16x16xf32>,
    %c0_i32_10 = arith.constant 0 : i32
    %8 = arith.cmpi eq, %arg1, %c0_i32_10 : i32
    %9 = arith.extui %8 : i1 to i32
    %c0_i32_11 = arith.constant 0 : i32
    %10 = arith.cmpi ne, %9, %c0_i32_11 : i32
    scf.if %10 {
      %c0_12 = arith.constant 0 : index
      %c0_13 = arith.constant 0 : index
      %c0_14 = arith.constant 0 : index
      %11 = vector.load %arg4[%c0_12, %c0_13, %c0_14] : memref<3x16x16xf32, #tpu.memory_space<vmem>>, vector<1x16x16xf32>
      %12 = vector.shape_cast %11 : vector<1x16x16xf32> to vector<16x16xf32>
      %13 = vector.shape_cast %12 : vector<16x16xf32> to vector<1x16x16xf32>
      %cst = arith.constant dense<0.000000e+00> : vector<1xf32>
      %14 = vector.multi_reduction <add>, %13, %cst [1, 2] : vector<1x16x16xf32> to vector<1xf32>
      %15 = vector.shape_cast %14 : vector<1xf32> to vector<1x1x1xf32>
      %16 = vector.extract %15[0, 0, 0] : f32 from vector<1x1x1xf32>
      %17 = vector.broadcast %16 : f32 to vector<1x1xf32>
      %cst_15 = arith.constant 3.906250e-03 : f32
      %18 = vector.broadcast %cst_15 : f32 to vector<1x1xf32>
      %19 = arith.mulf %17, %18 : vector<1x1xf32>
      %c1 = arith.constant 1 : index
      %c0_16 = arith.constant 0 : index
      %c0_17 = arith.constant 0 : index
      %20 = vector.load %arg4[%c1, %c0_16, %c0_17] : memref<3x16x16xf32, #tpu.memory_space<vmem>>, vector<1x16x16xf32>
      %21 = vector.shape_cast %20 : vector<1x16x16xf32> to vector<16x16xf32>
      %22 = vector.shape_cast %21 : vector<16x16xf32> to vector<1x16x16xf32>
      %cst_18 = arith.constant dense<0.000000e+00> : vector<1xf32>
      %23 = vector.multi_reduction <add>, %22, %cst_18 [1, 2] : vector<1x16x16xf32> to vector<1xf32>
      %24 = vector.shape_cast %23 : vector<1xf32> to vector<1x1x1xf32>
      %25 = vector.extract %24[0, 0, 0] : f32 from vector<1x1x1xf32>
      %26 = vector.broadcast %25 : f32 to vector<1x1xf32>
      %cst_19 = arith.constant 3.906250e-03 : f32
      %27 = vector.broadcast %cst_19 : f32 to vector<1x1xf32>
      %28 = arith.mulf %26, %27 : vector<1x1xf32>
      %c2 = arith.constant 2 : index
      %c0_20 = arith.constant 0 : index
      %c0_21 = arith.constant 0 : index
      %29 = vector.load %arg4[%c2, %c0_20, %c0_21] : memref<3x16x16xf32, #tpu.memory_space<vmem>>, vector<1x16x16xf32>
      %30 = vector.shape_cast %29 : vector<1x16x16xf32> to vector<16x16xf32>
      %31 = vector.shape_cast %30 : vector<16x16xf32> to vector<1x16x16xf32>
      %cst_22 = arith.constant dense<0.000000e+00> : vector<1xf32>
      %32 = vector.multi_reduction <add>, %31, %cst_22 [1, 2] : vector<1x16x16xf32> to vector<1xf32>
      %33 = vector.shape_cast %32 : vector<1xf32> to vector<1x1x1xf32>
      %34 = vector.extract %33[0, 0, 0] : f32 from vector<1x1x1xf32>
      %35 = vector.broadcast %34 : f32 to vector<1x1xf32>
      %cst_23 = arith.constant 3.906250e-03 : f32
      %36 = vector.broadcast %cst_23 : f32 to vector<1x1xf32>
      %37 = arith.mulf %35, %36 : vector<1x1xf32>
      %38 = arith.subf %19, %28 : vector<1x1xf32>
      %39 = arith.subf %19, %28 : vector<1x1xf32>
      %40 = arith.mulf %38, %39 : vector<1x1xf32>
      %41 = arith.subf %19, %37 : vector<1x1xf32>
      %42 = arith.subf %19, %37 : vector<1x1xf32>
      %43 = arith.mulf %41, %42 : vector<1x1xf32>
      %44 = arith.subf %37, %28 : vector<1x1xf32>
      %45 = arith.subf %37, %28 : vector<1x1xf32>
      %46 = arith.mulf %44, %45 : vector<1x1xf32>
      %47 = arith.mulf %40, %40 : vector<1x1xf32>
      %48 = arith.mulf %43, %43 : vector<1x1xf32>
      %49 = arith.addf %47, %48 : vector<1x1xf32>
      %50 = arith.mulf %46, %46 : vector<1x1xf32>
      %51 = arith.addf %49, %50 : vector<1x1xf32>
      %52 = math.sqrt %51 : vector<1x1xf32>
      %53 = vector.shape_cast %52 : vector<1x1xf32> to vector<1x1x1xf32>
      %c0_24 = arith.constant 0 : index
      %c0_25 = arith.constant 0 : index
      %c0_26 = arith.constant 0 : index
      %54 = vector.load %arg3[%c0_24, %c0_25, %c0_26] : memref<1x1x1xf32, #tpu.memory_space<vmem>>, vector<1x1x1xf32>
      tpu.vector_store %arg3[%c0_24, %c0_25, %c0_26], %53 {strides = array<i32>} : memref<1x1x1xf32, #tpu.memory_space<vmem>>, vector<1x1x1xf32>,
    } else {
    }
    return
  }
  func.func @transform_0(%arg0: i32, %arg1: i32) -> (i32, i32, i32, i32) {
    %c0_i32 = arith.constant 0 : i32
    %c0_i32_0 = arith.constant 0 : i32
    %c0_i32_1 = arith.constant 0 : i32
    return %arg0, %c0_i32, %arg1, %c0_i32_0 : i32, i32, i32, i32
  }
  func.func @transform_1(%arg0: i32, %arg1: i32) -> (i32, i32, i32) {
    %c0_i32 = arith.constant 0 : i32
    %c0_i32_0 = arith.constant 0 : i32
    %c0_i32_1 = arith.constant 0 : i32
    return %arg0, %c0_i32, %c0_i32_0 : i32, i32, i32
  }
}

</mosaic_0001>

<bundles_post_ra>
// kernel: tpu_custom_call.1
= control target key start
LH: loop header
LB: loop body
LE: loop exit
PB: predicated region body
PF: predicated region fallthrough
CT: control target
= control target key end

     0   :  { %6 = vsyncpa [#allocation4], 0  ;;  %s608_s0 = inlined_call_operand.hbm [shape: f32[2,3,16,16], index: 0, kind: input, shape index: {}]   ;;  %s609_s1 = inlined_call_operand.vmem [shape: f32[2,1,1], index: 1, kind: output, shape index: {}]  }
   0x1   :  { %8 = vsyncpa [#allocation4 + $0x1], 0  ;;  %s508_s6 = smov 0   ;;  %s510_s7 = smov 0  }
   0x2   :  { %s512_s8 = smov 0   ;;  %s514_s9 = smov 0  }
   0x3   :  { %s516_s10 = smov 0   ;;  %s518_s11 = smov 0  }
   0x4 LB: > { %s336_s12 = sadd.s32 4294967295, %s493_s11   ;;  %s26_s13 = sadd.s32 1, %s489_s10  ;;  %s493_s11 = sphi %s518_s11, %s14_s11   ;;  %s489_s10 = sphi %s516_s10, %s615_s10   ;;  %s485_s9 = sphi %s514_s9, %s614_s9   ;;  %s481_s8 = sphi %s512_s8, %s613_s8   ;;  %s477_s7 = sphi %s510_s7, %s612_s7   ;;  %s473_s6 = sphi %s508_s6, %s611_s6  }
   0x5   : > { %p28_p0 = scmp.ge.s32.totalorder %s26_s13, 2  ;;  %s35_s14 = sadd.s32 1, %s481_s8 }
   0x6   : > { %p42_p1 = scmp.ne.s32.totalorder %s481_s8, %s477_s7  ;;  %p43_p2 = scmp.eq.s32.totalorder %s493_s11, 0 }
   0x7   : > { %s617_s13 = smov (%p28_p0, %s26_s13), 0  ;;  %p48_p4 = scmp.ne.s32.totalorder %s477_s7, %s473_s6 }
   0x8   : > { %p44_p3 = por %p43_p2, %p42_p1  ;;  %s30_s15 = ssub.s32 %s489_s10, %s617_s13 }
   0x9   : > { %p49_p5 = scmp.eq.s32.totalorder %s336_s12, 0  ;;  %p33_p6 = scmp.eq.s32.totalorder %s30_s15, 0 }
   0xa   : > { %p359_p8 = scmp.lt.s32.totalorder %s493_s11, 2  ;;  %s98_s18 = sand.u32 1, %s481_s8  }
   0xb   : > { %p547_p7 = por %p49_p5, %p48_p4  ;;  %s345_s19 = smul.u32 48, %s489_s10 }
   0xc   : > { %s553_s17 = scalar_select %p33_p6, %s481_s8, %s35_s14  }
   0xd   : > { %s344_s20 = smul.u32 48, %s98_s18  ;;  %s109_s23 = scalar_lea.hbm %s608_s0, %s345_s19 }
   0xe   : > { %p356_p9 = pnand %p359_p8, %p44_p3  ;;  %s110_s24 = sshll.u32 %s109_s23, 4  ;;  %s111_s24 = int_to_ptr.hbm [resolvable:$true] %s110_s24 }
   0xf   : > { %s102_s25 = scalar_lea.vmem [#allocation3], %s344_s20  ;;  %s99_s27 = scalar_lea.sflag [#allocation4], %s98_s18 }
  0x10   : > { %s112_s26 = sshll.u32 %s102_s25, 4  ;;  %s495_s28 = smov 128   ;;  %s113_s26 = int_to_ptr.vmem [resolvable:$true] %s112_s26 }
  0x11   : > { %s496_s29 = smov 8   ;;  %p341_p10 = scmp.ge.s32.totalorder %s493_s11, 1 }
  0x12   : > { %358 = dma.hbm_to_vmem [thread:$0]  (!%p356_p9), %s111_s24, 768, %s113_s26, %s99_s27, %s495_s28, %s495_s28, %s496_s29  }
  0x13   : > { %p120_p11 = scmp.lt.s32.totalorder %s493_s11, 3 }
  0x15   : > { %p121_p12 = pnand %p341_p10, %p120_p11 }
  0x16   : > { %s126_s30 = sand.u32 (!%p121_p12), 1, %s477_s7  }
  0x17   : > { %124 = sbr.rel (%p121_p12) target bundleno = 274 (0x112), region = 24  ;;  %s127_s3 = scalar_lea.sflag (!%p121_p12), [#allocation4], %s126_s30 }
  0x18   : > { %s346_s2 = smul.u32 (!%p121_p12), 48, %s126_s30 }
  0x1a   : > { %s130_s4 = scalar_lea.vmem (!%p121_p12), [#allocation3], %s346_s2 }
  0x1c   : > { %468 = dma.done.wait (%p547_p7), %s127_s3, 768  }
  0x1d   : > { %470 = vsyncadd (%p547_p7), %s127_s3, 4294966528  ;;  %vm156_vm0 = vcmask 130048   ;;  %v497_v0 = vmov 0.0   ;;  %v169_v1 = vld [vmem:[%s130_s4] sm:$0xff]  ;;  %v170_v2 = vld [vmem:[%s130_s4 + $0x8] sm:$0xff]  ;;  %p149_p13 = scmp.lt.s32.totalorder %s485_s9, 1 }
  0x1e   : > { %157 = vst.msk [vmem:[#allocation2] sm:$0xff] %vm156_vm0, %v497_v0  ;;  %v171_v4 = vld [vmem:[%s130_s4 + $0x10] sm:$0xff]  ;;  %v172_v7 = vld [vmem:[%s130_s4 + $0x18] sm:$0xff]  ;;  %v173_v9 = vld [vmem:[%s130_s4 + $0x20] sm:$0xff]  ;;  %vm264_vm2 = vcmask 0  }
  0x1f   : > { %158 = vst.msk [vmem:[#allocation2 + $0x8] sm:$0xff] %vm156_vm0, %v497_v0  ;;  %v174_v11 = vld [vmem:[%s130_s4 + $0x28] sm:$0xff]  ;;  %s619_s9 = smov (!%p149_p13, %s485_s9), 1 }
  0x20   : > { %159 = vst.msk [vmem:[#allocation2 + $0x10] sm:$0xff] %vm156_vm0, %v497_v0  ;;  %s151_s16 = scalar_lea.vmem %s609_s1, %s619_s9 }
  0x21   : > { %160 = vst.msk [vmem:[#allocation2 + $0x18] sm:$0xff] %vm156_vm0, %v497_v0 }
  0x22   : > { %161 = vst.msk [vmem:[#allocation2 + $0x20] sm:$0xff] %vm156_vm0, %v497_v0 }
  0x23   : > { %162 = vst.msk [vmem:[#allocation2 + $0x28] sm:$0xff] %vm156_vm0, %v497_v0 }
  0x25   : > { %v163_v3 = vld [vmem:[#allocation2] sm:$0xff] }
  0x26   : > { %v164_v5 = vld [vmem:[#allocation2 + $0x8] sm:$0xff]  ;;  %v175_v6 = vadd.f32 %v169_v1, %v163_v3 }
  0x27   : > { %v176_v8 = vadd.f32 %v170_v2, %v164_v5  ;;  %v165_v10 = vld [vmem:[#allocation2 + $0x10] sm:$0xff] }
  0x28   : > { %182 = vst.msk [vmem:[#allocation2] sm:$0xff] %vm156_vm0, %v175_v6  ;;  %v166_v12 = vld [vmem:[#allocation2 + $0x18] sm:$0xff]  ;;  %v177_v13 = vadd.f32 %v171_v4, %v165_v10 }
  0x29   : > { %183 = vst.msk [vmem:[#allocation2 + $0x8] sm:$0xff] %vm156_vm0, %v176_v8  ;;  %v167_v14 = vld [vmem:[#allocation2 + $0x20] sm:$0xff]  ;;  %v178_v15 = vadd.f32 %v172_v7, %v166_v12 }
  0x2a   : > { %v168_v16 = vld [vmem:[#allocation2 + $0x28] sm:$0xff]  ;;  %v179_v17 = vadd.f32 %v173_v9, %v167_v14  ;;  %184 = vst.msk [vmem:[#allocation2 + $0x10] sm:$0xff] %vm156_vm0, %v177_v13 }
  0x2b   : > { %v180_v18 = vadd.f32 %v174_v11, %v168_v16  ;;  %185 = vst.msk [vmem:[#allocation2 + $0x18] sm:$0xff] %vm156_vm0, %v178_v15 }
  0x2c   : > { %186 = vst.msk [vmem:[#allocation2 + $0x20] sm:$0xff] %vm156_vm0, %v179_v17 }
  0x2d   : > { %187 = vst.msk [vmem:[#allocation2 + $0x28] sm:$0xff] %vm156_vm0, %v180_v18 }
  0x2f   : > { %v191_v19 = vld [vmem:[#allocation2] sm:$0xff] }
  0x30   : > { %v192_v20 = vld [vmem:[#allocation2 + $0x8] sm:$0xff]  ;;  %v193_v21 = vsel %vm156_vm0, %v191_v19, 0.0 }
  0x31   : > { %v194_v22 = vsel %vm156_vm0, %v192_v20, 0.0  ;;  %v208_v24 = vld [vmem:[#allocation2 + $0x10] sm:$0xff] }
  0x32   : > { %v195_v23 = vadd.f32 %v194_v22, %v193_v21  ;;  %v209_v25 = vld [vmem:[#allocation2 + $0x18] sm:$0xff]  ;;  %v210_v30 = vsel %vm156_vm0, %v208_v24, 0.0 }
  0x33   : > { %v225_v26 = vld [vmem:[#allocation2 + $0x20] sm:$0xff]  ;;  %v211_v31 = vsel %vm156_vm0, %v209_v25, 0.0 }
  0x34   : > { %196 = vadd.xlane.f32.xlu0 %v195_v23  ;;  %v226_v27 = vld [vmem:[#allocation2 + $0x28] sm:$0xff]  ;;  %v227_v28 = vsel %vm156_vm0, %v225_v26, 0.0  ;;  %v212_v33 = vadd.f32 %v211_v31, %v210_v30 }
  0x35   : > { %v228_v29 = vsel %vm156_vm0, %v226_v27, 0.0 }
  0x36   : > { %v229_v32 = vadd.f32 %v228_v29, %v227_v28 }
  0x38   : > { %230 = vadd.xlane.f32.xlu1 %v229_v32 }
  0x3c   : > { %213 = vadd.xlane.f32.xlu0 %v212_v33 }
  0xa7   : > { %v197_v34 = vpop.xlane.xlu0 %196 }
  0xa8   : > { %v198_v35 = vrot.slane %v197_v34, 4 }
  0xaa   : > { %v199_v36 = vadd.f32 %v198_v35, %v197_v34 }
  0xab   : > { %v231_v37 = vpop.xlane.xlu1 %230 }
  0xac   : > { %v200_v38 = vrot.slane %v199_v36, 2  ;;  %v232_v39 = vrot.slane %v231_v37, 4 }
  0xae   : > { %v233_v40 = vadd.f32 %v232_v39, %v231_v37  ;;  %v201_v41 = vadd.f32 %v200_v38, %v199_v36 }
  0xaf   : > { %v214_v42 = vpop.xlane.xlu0 %213 }
  0xb0   : > { %v234_v43 = vrot.slane %v233_v40, 2  ;;  %v215_v44 = vrot.slane %v214_v42, 4  ;;  %v202_v45 = vrot.slane %v201_v41, 1 }
  0xb2   : > { %v216_v46 = vadd.f32 %v215_v44, %v214_v42  ;;  %v203_v47 = vadd.f32 %v202_v45, %v201_v41  ;;  %v235_v48 = vadd.f32 %v234_v43, %v233_v40 }
  0xb4   : > { %v217_v49 = vrot.slane %v216_v46, 2  ;;  %347 = vpush %v203_v47  ;;  %v236_v51 = vrot.slane %v235_v48, 1 }
  0xb6   : > { %v218_v50 = vadd.f32 %v217_v49, %v216_v46  ;;  %v237_v54 = vadd.f32 %v236_v51, %v235_v48 }
  0xb8   : > { %v219_v52 = vrot.slane %v218_v50, 1 }
  0xba   : > { %v220_v53 = vadd.f32 %v219_v52, %v218_v50 }
  0xbc   : > { %349 = vpush %v220_v53 }
  0xbd   : > { %351 = vpush %v237_v54 }
  0xe5   : > { %s348_s5 = spop %347 }
  0xe6   : > { %v205_v55 = vstv %s348_s5 }
  0xe7   : > { %v206_v57 = vmul.f32 0.00390625, %v205_v55 }
  0xed   : > { %s350_s6 = spop %349 }
  0xee   : > { %v222_v56 = vstv %s350_s6  ;;  %s352_s12 = spop %351 }
  0xef   : > { %v223_v58 = vmul.f32 0.00390625, %v222_v56  ;;  %v239_v59 = vstv %s352_s12 }
  0xf0   : > { %v240_v60 = vmul.f32 0.00390625, %v239_v59 }
  0xf1   : > { %v241_v61 = vsub.f32 %v206_v57, %v223_v58 }
  0xf2   : > { %v243_v62 = vsub.f32 %v206_v57, %v240_v60  ;;  %v245_v63 = vsub.f32 %v240_v60, %v223_v58 }
  0xf3   : > { %v242_v0 = vmul.f32 %v241_v61, %v241_v61 }
  0xf4   : > { %v244_v1 = vmul.f32 %v243_v62, %v243_v62  ;;  %v246_v2 = vmul.f32 %v245_v63, %v245_v63 }
  0xf5   : > { %v247_v3 = vmul.f32 %v242_v0, %v242_v0 }
  0xf6   : > { %v248_v4 = vmul.f32 %v244_v1, %v244_v1  ;;  %v250_v6 = vmul.f32 %v246_v2, %v246_v2 }
  0xf8   : > { %v249_v5 = vadd.f32 %v248_v4, %v247_v3 }
  0xfa   : > { %v251_v7 = vadd.f32 %v250_v6, %v249_v5 }
  0xfc   : > { %411 = vrsqrt.f32 %v251_v7  ;;  %vm259_vm1 = vcmp.eq.f32.partialorder %v251_v7, inf  ;;  %v262_v15 = vand.u32 2147483648, %v251_v7  ;;  %vm261_vm3 = vcmp.eq.f32.partialorder %v251_v7, 0.0 }
 0x102   : > { %v412_v8 = vpop.eup %411 }
 0x103   : > { %v253_v9 = vmul.f32 %v412_v8, %v251_v7 }
 0x105   : > { %v254_v10 = vmul.f32 %v412_v8, %v253_v9 }
 0x107   : > { %v255_v11 = vmul.f32 0.5, %v254_v10 }
 0x109   : > { %v256_v12 = vsub.f32 1.5, %v255_v11 }
 0x10b   : > { %v257_v13 = vmul.f32 %v412_v8, %v256_v12 }
 0x10d   : > { %v258_v14 = vmul.f32 %v257_v13, %v251_v7 }
 0x10f   : > { %v260_v16 = vsel %vm259_vm1, %v251_v7, %v258_v14 }
 0x110   : > { %v263_v17 = vsel %vm261_vm3, %v262_v15, %v260_v16 }
 0x111   : > { %265 = vst.msk [vmem:[%s151_s16] sm:$0x1] %vm264_vm2, %v263_v17 }
 0x112 PF: > { %s14_s11 = sadd.s32 1, %s493_s11   ;;  %s611_s6 = smov %s477_s7 }
 0x113   : > { %p11_p0 = scmp.ge.s32.totalorder %s14_s11, 4   ;;  %s612_s7 = smov %s481_s8 }
 0x114   : > { %s613_s8 = smov %s553_s17  ;;  %s614_s9 = smov %s489_s10 }
 0x115   : > { %s615_s10 = smov %s617_s13  ;;  %13 = sbr.rel (!%p11_p0) target bundleno = 4 (0x4), region = 74 }
 0x11a   :  { %283 = vsyncpa [#allocation4], 1 }
 0x11b   :  { %285 = vsyncpa [#allocation4 + $0x1], 1 }

</bundles_post_ra>
